<compile_context>
chip_gen: v7x
topology: tpu7x:2x2x1
jax: 0.10.0
libtpu: 0.0.40
codegen_flags: <defaults>
</compile_context>

<pallas_src>
import functools

import numpy as np
import jax
import jax.numpy as jnp
from jax.experimental import pallas as pl
from jax.experimental.pallas import tpu as pltpu


# ----------------------------------------------------------------------------
# Fused kernel: LayerNorm -> MLP -> class head -> complete_duals
# ----------------------------------------------------------------------------
def _fused_kernel(training, n_classes, cls_stride, n_mid,
                  x_ref, ln_ref, w0_ref, wh_ref, w4_ref,
                  b_ref, head_ref, obj_ref, eqs_ref,
                  out_mu_ref, out_lamb_ref):
    # ---- LayerNorm over features (PyTorch defaults: eps=1e-5) ----
    x = x_ref[...]                                            # (TB, xdim) f32
    mean = jnp.mean(x, axis=-1, keepdims=True)
    var = jnp.mean(jnp.square(x - mean), axis=-1, keepdims=True)
    h = (x - mean) * jax.lax.rsqrt(var + 1e-5)
    h = h * ln_ref[0:1, :] + ln_ref[1:2, :]

    # ---- first Linear + ReLU (bf16 weights, f32 accumulate) ----
    h = jnp.dot(h.astype(w0_ref.dtype), w0_ref[...],
                preferred_element_type=jnp.float32) + b_ref[0:1, :]
    h = jnp.maximum(h, 0.0)

    # ---- hidden-to-hidden Linear + ReLU layers ----
    for i in range(n_mid):
        h = jnp.dot(h.astype(wh_ref.dtype), wh_ref[i],
                    preferred_element_type=jnp.float32) + b_ref[i + 1:i + 2, :]
        h = jnp.maximum(h, 0.0)

    # ---- output Linear: class-major logits, 128-lane-aligned class blocks ----
    logits = jnp.dot(h.astype(w4_ref.dtype), w4_ref[...],
                     preferred_element_type=jnp.float32) + head_ref[0:1, :]

    blk = [logits[:, c * cls_stride:(c + 1) * cls_stride]
           for c in range(n_classes)]                         # (TB, cls_stride)
    cls = [head_ref[1:2, c * cls_stride:(c + 1) * cls_stride]
           for c in range(n_classes)]                         # (1,  cls_stride)

    if training:
        # softmax over classes (elementwise over aligned blocks), expectation
        gmax = blk[0]
        for c in range(1, n_classes):
            gmax = jnp.maximum(gmax, blk[c])
        denom = jnp.zeros_like(gmax)
        num = jnp.zeros_like(gmax)
        for c in range(n_classes):
            e = jnp.exp(blk[c] - gmax)
            denom = denom + e
            num = num + e * cls[c]
        lamb = num / denom
    else:
        # unrolled argmax over classes; strict ">" keeps first-max (torch conv.)
        best = blk[0]
        lamb = jnp.broadcast_to(cls[0], best.shape)
        for c in range(1, n_classes):
            better = blk[c] > best
            best = jnp.where(better, blk[c], best)
            lamb = jnp.where(better, jnp.broadcast_to(cls[c], best.shape), lamb)

    out_lamb_ref[...] = lamb                                  # (TB, cls_stride)

    # ---- complete_duals: relu split + reorder pre-folded into eqs/obj ----
    mu = obj_ref[...] + jnp.dot(lamb, eqs_ref[...],
                                preferred_element_type=jnp.float32)
    out_mu_ref[...] = jnp.maximum(mu, 0.0)                    # (TB, mu_pad)


# ----------------------------------------------------------------------------
# Wrapper helpers
# ----------------------------------------------------------------------------
def _round_up(v, m):
    return ((v + m - 1) // m) * m


def _pad2d(a, rows, cols):
    return jnp.pad(a, ((0, rows - a.shape[0]), (0, cols - a.shape[1])))


def _signed_dual_perm(num_g, num_l, n_primal):
    """(n_primal, 2*n_primal) signed permutation so that
    relu(mu @ P) == concat([relu(mu)[:, :g], relu(-mu)[:, :g],
                            relu(mu)[:, g:g+l], relu(-mu)[:, g:g+l],
                            relu(mu)[:, g+l:], relu(-mu)[:, g+l:]], axis=1)."""
    num_n = n_primal - num_g - num_l
    segs = [(0, num_g, 0, num_g),
            (num_g, num_g + num_l, 2 * num_g, 2 * num_g + num_l),
            (num_g + num_l, n_primal,
             2 * num_g + 2 * num_l, 2 * num_g + 2 * num_l + num_n)]
    P = np.zeros((n_primal, 2 * n_primal), np.float32)
    for start, end, lb0, ub0 in segs:
        for i in range(start, end):
            P[i, lb0 + (i - start)] = 1.0    # relu(+mu) slot
            P[i, ub0 + (i - start)] = -1.0   # relu(-mu) slot
    return jnp.asarray(P)


# ----------------------------------------------------------------------------
# Forward wrapper (single pallas_call)
# ----------------------------------------------------------------------------
def dual_classification_forward(params, data, x, training=False,
                                param_dtype=jnp.bfloat16):
    x = jnp.asarray(x, jnp.float32)
    B, xdim = x.shape
    neq = data["n_dual_vars"]
    n_classes = data["n_classes"]
    num_g, num_l = data["num_g"], data["num_l"]
    n_primal = data["eq_cm"].shape[1]

    linears = params["linears"]
    n_layers = len(linears) - 1          # ReLU'd hidden layers
    n_mid = n_layers - 1                 # hidden->hidden matmuls
    assert n_mid >= 1
    w0, _ = linears[0]
    w4, b4 = linears[-1]
    hidden = w0.shape[1]
    hp = _round_up(hidden, 128)

    cls_stride = _round_up(neq, 128)     # lane stride of one class block
    out_pd = n_classes * cls_stride
    mu_pad = _round_up(2 * n_primal, 128)

    # --- weights: zero-pad to lane-dense tiles, store in bf16 ---
    w0p = _pad2d(w0, xdim, hp).astype(param_dtype)
    whp = jnp.stack([_pad2d(w, hp, hp) for (w, _) in linears[1:-1]]
                    ).astype(param_dtype)                         # (n_mid,hp,hp)
    bstack = jnp.concatenate([_pad2d(b, 1, hp) for (_, b) in linears[:-1]],
                             axis=0).astype(jnp.float32)          # (n_layers,hp)

    # --- output layer: class-major, each class block padded to cls_stride ---
    # old column j*n_classes + c  ->  new column c*cls_stride + j
    w4_cm = jnp.transpose(w4.reshape(hidden, neq, n_classes), (0, 2, 1))
    w4_cm = jnp.pad(w4_cm, ((0, hp - hidden), (0, 0), (0, cls_stride - neq)))
    w4p = w4_cm.reshape(hp, out_pd).astype(param_dtype)

    b4_cm = jnp.transpose(b4.reshape(neq, n_classes), (1, 0))
    b4_cm = jnp.pad(b4_cm, ((0, 0), (0, cls_stride - neq))).reshape(1, out_pd)
    classes_cm = jnp.broadcast_to(
        jnp.reshape(data["classes"].astype(jnp.float32), (n_classes, 1)),
        (n_classes, cls_stride)).reshape(1, out_pd)
    head = jnp.concatenate([b4_cm, classes_cm], axis=0).astype(jnp.float32)

    # --- fold complete_duals' relu split + reorder into eq_cm / obj_coeff ---
    P = _signed_dual_perm(num_g, num_l, n_primal)       # (n_primal, 2*n_primal)
    eqsp = _pad2d(jnp.dot(data["eq_cm"].astype(jnp.float32), P),
                  cls_stride, mu_pad)                   # (cls_stride, mu_pad)
    objp = _pad2d(jnp.dot(data["obj_coeff"].astype(jnp.float32), P),
                  1, mu_pad)                            # (1, mu_pad)

    ln = jnp.concatenate([params["ln_gamma"], params["ln_beta"]],
                         axis=0).astype(jnp.float32)    # (2, xdim)

    # --- grid / tiling ---
    tb = min(B, 256)                     # fill the 256-wide MXU on v6e/v7x
    num_steps = pl.cdiv(B, tb)
    grid = (num_steps,)
    # Megacore only when enough batch tiles amortize per-core weight DMA.
    dim_sem = ("parallel",) if num_steps >= 4 else ("arbitrary",)

    row = lambda i: (i, 0)
    c2 = lambda i: (0, 0)
    c3 = lambda i: (0, 0, 0)
    single = pl.Buffered(1)              # constants: no double-buffering

    in_specs = [
        pl.BlockSpec((tb, xdim), row),
        pl.BlockSpec((2, xdim), c2, pipeline_mode=single),
        pl.BlockSpec((xdim, hp), c2, pipeline_mode=single),
        pl.BlockSpec((n_mid, hp, hp), c3, pipeline_mode=single),
        pl.BlockSpec((hp, out_pd), c2, pipeline_mode=single),
        pl.BlockSpec((n_layers, hp), c2, pipeline_mode=single),
        pl.BlockSpec((2, out_pd), c2, pipeline_mode=single),
        pl.BlockSpec((1, mu_pad), c2, pipeline_mode=single),
        pl.BlockSpec((cls_stride, mu_pad), c2, pipeline_mode=single),
    ]
    out_specs = (pl.BlockSpec((tb, mu_pad), row),
                 pl.BlockSpec((tb, cls_stride), row))

    # --- explicit VMEM budget (weights single-buffered, acts/outs pipelined) ---
    wi = jnp.dtype(param_dtype).itemsize
    est = (wi * (xdim * hp + n_mid * hp * hp + hp * out_pd)
           + 4 * (n_layers * hp + 2 * out_pd + mu_pad + cls_stride * mu_pad
                  + 2 * xdim)
           + 4 * tb * 2 * (xdim + mu_pad + cls_stride)
           + 4 * tb * (3 * hp + out_pd))
    vmem_limit = int(min(max(est * 3 // 2 + (2 << 20), 16 << 20), 64 << 20))

    kernel = functools.partial(_fused_kernel, training, n_classes,
                               cls_stride, n_mid)

    out_mu_p, out_lamb_p = pl.pallas_call(
        kernel,
        out_shape=(jax.ShapeDtypeStruct((B, mu_pad), jnp.float32),
                   jax.ShapeDtypeStruct((B, cls_stride), jnp.float32)),
        grid=grid,
        in_specs=in_specs,
        out_specs=out_specs,
        compiler_params=pltpu.CompilerParams(
            dimension_semantics=dim_sem,
            vmem_limit_bytes=vmem_limit),
    )(x, ln, w0p, whp, w4p, bstack, head, objp, eqsp)

    return out_mu_p[:, :2 * n_primal], out_lamb_p[:, :neq]


# ----------------------------------------------------------------------------
# Pure-JAX reference (same bf16-quantized weights/activations) for checking
# ----------------------------------------------------------------------------
def _reference_forward(params, data, x, training, param_dtype=jnp.bfloat16):
    q = lambda a: a.astype(param_dtype).astype(jnp.float32)
    g, beta = params["ln_gamma"], params["ln_beta"]
    mean = jnp.mean(x, -1, keepdims=True)
    var = jnp.mean(jnp.square(x - mean), -1, keepdims=True)
    h = (x - mean) * jax.lax.rsqrt(var + 1e-5) * g + beta
    for (w, b) in params["linears"][:-1]:
        h = jnp.maximum(jnp.dot(q(h), q(w)) + b, 0.0)
    w4, b4 = params["linears"][-1]
    logits = jnp.dot(q(h), q(w4)) + b4
    neq, nc = data["n_dual_vars"], data["n_classes"]
    logits = logits.reshape(-1, neq, nc)
    classes = data["classes"]
    if training:
        p = jax.nn.softmax(logits, axis=-1)
        lamb = jnp.sum(p * classes, axis=-1)
    else:
        lamb = classes[jnp.argmax(logits, axis=-1)]
    mu = data["obj_coeff"] + jnp.dot(lamb, data["eq_cm"])
    mu_lb, mu_ub = jnp.maximum(mu, 0.0), jnp.maximum(-mu, 0.0)
    g_, l_ = data["num_g"], data["num_l"]
    out_mu = jnp.concatenate([mu_lb[:, :g_], mu_ub[:, :g_],
                              mu_lb[:, g_:g_ + l_], mu_ub[:, g_:g_ + l_],
                              mu_lb[:, g_ + l_:], mu_ub[:, g_ + l_:]], axis=1)
    return out_mu, lamb


# ----------------------------------------------------------------------------
# Deterministic parameter / data construction
# ----------------------------------------------------------------------------
def build_params_and_data(key, xdim, hidden_size_factor=5.0, n_layers=4):
    num_g, num_l, num_n = 3, 4, 5
    n_primal = num_g + num_l + num_n                  # 12
    neq = 8                                           # data.neq -> n_dual_vars
    cost_vec = jnp.array([10.0, 20.0, 20.0, 30.0], jnp.float32)
    pVOLL = 1000.0
    classes = -1.0 * jnp.concatenate(
        [jnp.unique(cost_vec), jnp.array([pVOLL], jnp.float32)])
    n_classes = int(classes.shape[0])                 # 4

    k_eq, k_obj, key = jax.random.split(key, 3)
    eq_cm = jax.random.normal(k_eq, (neq, n_primal), jnp.float32)
    obj_coeff = jax.random.normal(k_obj, (1, n_primal), jnp.float32)

    data = dict(n_dual_vars=neq, n_classes=n_classes,
                num_g=num_g, num_l=num_l,
                eq_cm=eq_cm, obj_coeff=obj_coeff, classes=classes)

    hidden = int(hidden_size_factor * xdim)
    out_dim = neq * n_classes
    layer_sizes = [xdim] + [hidden] * n_layers + [out_dim]

    linears = []
    for in_size, out_size in zip(layer_sizes[:-1], layer_sizes[1:]):
        key, kw, kb = jax.random.split(key, 3)
        w = jax.random.normal(kw, (in_size, out_size), jnp.float32) * \
            jnp.sqrt(2.0 / in_size)                   # kaiming_normal_
        bound = 1.0 / jnp.sqrt(jnp.float32(in_size))
        b = jax.random.uniform(kb, (1, out_size), jnp.float32,
                               minval=-bound, maxval=bound)
        linears.append((w, b))

    params = dict(ln_gamma=jnp.ones((1, xdim), jnp.float32),
                  ln_beta=jnp.zeros((1, xdim), jnp.float32),
                  linears=linears)
    return params, data, key


if __name__ == "__main__":
    key = jax.random.PRNGKey(0)
    xdim = 16
    batch = 2

    params, data, key = build_params_and_data(key, xdim)
    key, kx = jax.random.split(key)
    x = jax.random.normal(kx, (batch, xdim), jnp.float32)

    out_mu_eval, out_lamb_eval = dual_classification_forward(
        params, data, x, training=False)
    out_mu_tr, out_lamb_tr = dual_classification_forward(
        params, data, x, training=True)
    jax.block_until_ready((out_mu_eval, out_lamb_eval, out_mu_tr, out_lamb_tr))

    n_primal = data["eq_cm"].shape[1]
    neq = data["n_dual_vars"]
    assert out_mu_eval.shape == (batch, 2 * n_primal)
    assert out_lamb_eval.shape == (batch, neq)
    assert out_mu_tr.shape == out_mu_eval.shape
    assert out_lamb_tr.shape == out_lamb_eval.shape
    assert bool(jnp.all(jnp.isfinite(out_mu_eval)))
    assert bool(jnp.all(jnp.isfinite(out_mu_tr)))

    # training branch vs pure-JAX reference (scale-relative tolerance)
    ref_mu, ref_lamb = _reference_forward(params, data, x, training=True)
    ref_mu, ref_lamb = np.asarray(ref_mu), np.asarray(ref_lamb)
    k_mu, k_lamb = np.asarray(out_mu_tr), np.asarray(out_lamb_tr)
    assert np.max(np.abs(k_lamb - ref_lamb)) <= \
        0.02 * (np.max(np.abs(ref_lamb)) + 1.0)
    assert np.max(np.abs(k_mu - ref_mu)) <= \
        0.02 * (np.max(np.abs(ref_mu)) + 1.0)

    # eval branch: every predicted lamb must be one of the class values
    classes_np = np.asarray(data["classes"])
    dmin = np.min(np.abs(np.asarray(out_lamb_eval)[..., None]
                         - classes_np[None, None, :]), axis=-1)
    assert np.all(dmin < 1e-2)

    print("KERNEL_OK")
</pallas_src>

<mosaic_0001>
module attributes {stable_mosaic.version = 11 : i64} {
  func.func @_fused_kernel(%arg0: i32, %arg1: memref<2x16xf32, #tpu.memory_space<vmem>>, %arg2: memref<2x16xf32, #tpu.memory_space<vmem>>, %arg3: memref<16x128xbf16, #tpu.memory_space<vmem>>, %arg4: memref<3x128x128xbf16, #tpu.memory_space<vmem>>, %arg5: memref<128x512xbf16, #tpu.memory_space<vmem>>, %arg6: memref<4x128xf32, #tpu.memory_space<vmem>>, %arg7: memref<2x512xf32, #tpu.memory_space<vmem>>, %arg8: memref<1x128xf32, #tpu.memory_space<vmem>>, %arg9: memref<128x128xf32, #tpu.memory_space<vmem>>, %arg10: memref<2x128xf32, #tpu.memory_space<vmem>>, %arg11: memref<2x128xf32, #tpu.memory_space<vmem>>) attributes {dimension_semantics = [#tpu.dimension_semantics<arbitrary>], iteration_bounds = array<i64: 1>, scalar_prefetch = 0 : i64, scratch_operands = 0 : i64, tpu.core_type = #tpu.core_type<tc>, window_params = [{transform_indices = @transform_0, window_bounds = array<i64: 2, 16>}, {pipeline_mode = #tpu.pipeline_mode<synchronous>, transform_indices = @transform_1, window_bounds = array<i64: 2, 16>}, {pipeline_mode = #tpu.pipeline_mode<synchronous>, transform_indices = @transform_2, window_bounds = array<i64: 16, 128>}, {pipeline_mode = #tpu.pipeline_mode<synchronous>, transform_indices = @transform_3, window_bounds = array<i64: 3, 128, 128>}, {pipeline_mode = #tpu.pipeline_mode<synchronous>, transform_indices = @transform_4, window_bounds = array<i64: 128, 512>}, {pipeline_mode = #tpu.pipeline_mode<synchronous>, transform_indices = @transform_5, window_bounds = array<i64: 4, 128>}, {pipeline_mode = #tpu.pipeline_mode<synchronous>, transform_indices = @transform_6, window_bounds = array<i64: 2, 512>}, {pipeline_mode = #tpu.pipeline_mode<synchronous>, transform_indices = @transform_7, window_bounds = array<i64: 1, 128>}, {pipeline_mode = #tpu.pipeline_mode<synchronous>, transform_indices = @transform_8, window_bounds = array<i64: 128, 128>}, {transform_indices = @transform_9, window_bounds = array<i64: 2, 128>}, {transform_indices = @transform_10, window_bounds = array<i64: 2, 128>}]} {
    %c0 = arith.constant 0 : index
    %c0_0 = arith.constant 0 : index
    %0 = vector.load %arg1[%c0, %c0_0] : memref<2x16xf32, #tpu.memory_space<vmem>>, vector<2x16xf32>
    %cst = arith.constant dense<0.000000e+00> : vector<2xf32>
    %1 = vector.multi_reduction <add>, %0, %cst [1] : vector<2x16xf32> to vector<2xf32>
    %2 = vector.shape_cast %1 : vector<2xf32> to vector<2x1xf32>
    %cst_1 = arith.constant 1.600000e+01 : f32
    %3 = vector.broadcast %cst_1 : f32 to vector<2x1xf32>
    %4 = arith.divf %2, %3 : vector<2x1xf32>
    %5 = vector.broadcast %4 : vector<2x1xf32> to vector<2x16xf32>
    %6 = arith.subf %0, %5 : vector<2x16xf32>
    %7 = arith.mulf %6, %6 : vector<2x16xf32>
    %cst_2 = arith.constant dense<0.000000e+00> : vector<2xf32>
    %8 = vector.multi_reduction <add>, %7, %cst_2 [1] : vector<2x16xf32> to vector<2xf32>
    %9 = vector.shape_cast %8 : vector<2xf32> to vector<2x1xf32>
    %cst_3 = arith.constant 1.600000e+01 : f32
    %10 = vector.broadcast %cst_3 : f32 to vector<2x1xf32>
    %11 = arith.divf %9, %10 : vector<2x1xf32>
    %12 = vector.broadcast %4 : vector<2x1xf32> to vector<2x16xf32>
    %13 = arith.subf %0, %12 : vector<2x16xf32>
    %cst_4 = arith.constant 9.99999974E-6 : f32
    %14 = vector.broadcast %cst_4 : f32 to vector<2x1xf32>
    %15 = arith.addf %11, %14 : vector<2x1xf32>
    %16 = math.rsqrt %15 : vector<2x1xf32>
    %17 = vector.broadcast %16 : vector<2x1xf32> to vector<2x16xf32>
    %18 = arith.mulf %13, %17 : vector<2x16xf32>
    %c0_5 = arith.constant 0 : index
    %c0_6 = arith.constant 0 : index
    %19 = vector.load %arg2[%c0_5, %c0_6] : memref<2x16xf32, #tpu.memory_space<vmem>>, vector<1x16xf32>
    %20 = vector.broadcast %19 : vector<1x16xf32> to vector<2x16xf32>
    %21 = arith.mulf %18, %20 : vector<2x16xf32>
    %c1 = arith.constant 1 : index
    %c0_7 = arith.constant 0 : index
    %22 = vector.load %arg2[%c1, %c0_7] : memref<2x16xf32, #tpu.memory_space<vmem>>, vector<1x16xf32>
    %23 = vector.broadcast %22 : vector<1x16xf32> to vector<2x16xf32>
    %24 = arith.addf %21, %23 : vector<2x16xf32>
    %25 = arith.truncf %24 : vector<2x16xf32> to vector<2x16xbf16>
    %c0_8 = arith.constant 0 : index
    %c0_9 = arith.constant 0 : index
    %26 = vector.load %arg3[%c0_8, %c0_9] : memref<16x128xbf16, #tpu.memory_space<vmem>>, vector<16x128xbf16>
    %cst_10 = arith.constant dense<0.000000e+00> : vector<2x128xf32>
    %27 = tpu.matmul %25, %26, %cst_10 {dimension_numbers = #tpu.dot_dimension_numbers<[1], [0], [0], [1], [0, 0, 1, 1], [], []>} : vector<2x16xbf16>, vector<16x128xbf16>, vector<2x128xf32> -> vector<2x128xf32>
    %c0_11 = arith.constant 0 : index
    %c0_12 = arith.constant 0 : index
    %28 = vector.load %arg6[%c0_11, %c0_12] : memref<4x128xf32, #tpu.memory_space<vmem>>, vector<1x128xf32>
    %29 = vector.broadcast %28 : vector<1x128xf32> to vector<2x128xf32>
    %30 = arith.addf %27, %29 : vector<2x128xf32>
    %cst_13 = arith.constant 0.000000e+00 : f32
    %31 = vector.broadcast %cst_13 : f32 to vector<2x128xf32>
    %32 = arith.maximumf %30, %31 : vector<2x128xf32>
    %33 = arith.truncf %32 : vector<2x128xf32> to vector<2x128xbf16>
    %c0_14 = arith.constant 0 : index
    %c0_15 = arith.constant 0 : index
    %c0_16 = arith.constant 0 : index
    %34 = vector.load %arg4[%c0_14, %c0_15, %c0_16] : memref<3x128x128xbf16, #tpu.memory_space<vmem>>, vector<1x128x128xbf16>
    %35 = vector.shape_cast %34 : vector<1x128x128xbf16> to vector<128x128xbf16>
    %cst_17 = arith.constant dense<0.000000e+00> : vector<2x128xf32>
    %36 = tpu.matmul %33, %35, %cst_17 {dimension_numbers = #tpu.dot_dimension_numbers<[1], [0], [0], [1], [0, 0, 1, 1], [], []>} : vector<2x128xbf16>, vector<128x128xbf16>, vector<2x128xf32> -> vector<2x128xf32>
    %c1_18 = arith.constant 1 : index
    %c0_19 = arith.constant 0 : index
    %37 = vector.load %arg6[%c1_18, %c0_19] : memref<4x128xf32, #tpu.memory_space<vmem>>, vector<1x128xf32>
    %38 = vector.broadcast %37 : vector<1x128xf32> to vector<2x128xf32>
    %39 = arith.addf %36, %38 : vector<2x128xf32>
    %cst_20 = arith.constant 0.000000e+00 : f32
    %40 = vector.broadcast %cst_20 : f32 to vector<2x128xf32>
    %41 = arith.maximumf %39, %40 : vector<2x128xf32>
    %42 = arith.truncf %41 : vector<2x128xf32> to vector<2x128xbf16>
    %c1_21 = arith.constant 1 : index
    %c0_22 = arith.constant 0 : index
    %c0_23 = arith.constant 0 : index
    %43 = vector.load %arg4[%c1_21, %c0_22, %c0_23] : memref<3x128x128xbf16, #tpu.memory_space<vmem>>, vector<1x128x128xbf16>
    %44 = vector.shape_cast %43 : vector<1x128x128xbf16> to vector<128x128xbf16>
    %cst_24 = arith.constant dense<0.000000e+00> : vector<2x128xf32>
    %45 = tpu.matmul %42, %44, %cst_24 {dimension_numbers = #tpu.dot_dimension_numbers<[1], [0], [0], [1], [0, 0, 1, 1], [], []>} : vector<2x128xbf16>, vector<128x128xbf16>, vector<2x128xf32> -> vector<2x128xf32>
    %c2 = arith.constant 2 : index
    %c0_25 = arith.constant 0 : index
    %46 = vector.load %arg6[%c2, %c0_25] : memref<4x128xf32, #tpu.memory_space<vmem>>, vector<1x128xf32>
    %47 = vector.broadcast %46 : vector<1x128xf32> to vector<2x128xf32>
    %48 = arith.addf %45, %47 : vector<2x128xf32>
    %cst_26 = arith.constant 0.000000e+00 : f32
    %49 = vector.broadcast %cst_26 : f32 to vector<2x128xf32>
    %50 = arith.maximumf %48, %49 : vector<2x128xf32>
    %51 = arith.truncf %50 : vector<2x128xf32> to vector<2x128xbf16>
    %c2_27 = arith.constant 2 : index
    %c0_28 = arith.constant 0 : index
    %c0_29 = arith.constant 0 : index
    %52 = vector.load %arg4[%c2_27, %c0_28, %c0_29] : memref<3x128x128xbf16, #tpu.memory_space<vmem>>, vector<1x128x128xbf16>
    %53 = vector.shape_cast %52 : vector<1x128x128xbf16> to vector<128x128xbf16>
    %cst_30 = arith.constant dense<0.000000e+00> : vector<2x128xf32>
    %54 = tpu.matmul %51, %53, %cst_30 {dimension_numbers = #tpu.dot_dimension_numbers<[1], [0], [0], [1], [0, 0, 1, 1], [], []>} : vector<2x128xbf16>, vector<128x128xbf16>, vector<2x128xf32> -> vector<2x128xf32>
    %c3 = arith.constant 3 : index
    %c0_31 = arith.constant 0 : index
    %55 = vector.load %arg6[%c3, %c0_31] : memref<4x128xf32, #tpu.memory_space<vmem>>, vector<1x128xf32>
    %56 = vector.broadcast %55 : vector<1x128xf32> to vector<2x128xf32>
    %57 = arith.addf %54, %56 : vector<2x128xf32>
    %cst_32 = arith.constant 0.000000e+00 : f32
    %58 = vector.broadcast %cst_32 : f32 to vector<2x128xf32>
    %59 = arith.maximumf %57, %58 : vector<2x128xf32>
    %60 = arith.truncf %59 : vector<2x128xf32> to vector<2x128xbf16>
    %c0_33 = arith.constant 0 : index
    %c0_34 = arith.constant 0 : index
    %61 = vector.load %arg5[%c0_33, %c0_34] : memref<128x512xbf16, #tpu.memory_space<vmem>>, vector<128x512xbf16>
    %cst_35 = arith.constant dense<0.000000e+00> : vector<2x512xf32>
    %62 = tpu.matmul %60, %61, %cst_35 {dimension_numbers = #tpu.dot_dimension_numbers<[1], [0], [0], [1], [0, 0, 1, 1], [], []>} : vector<2x128xbf16>, vector<128x512xbf16>, vector<2x512xf32> -> vector<2x512xf32>
    %c0_36 = arith.constant 0 : index
    %c0_37 = arith.constant 0 : index
    %63 = vector.load %arg7[%c0_36, %c0_37] : memref<2x512xf32, #tpu.memory_space<vmem>>, vector<1x512xf32>
    %64 = vector.broadcast %63 : vector<1x512xf32> to vector<2x512xf32>
    %65 = arith.addf %62, %64 : vector<2x512xf32>
    %66 = vector.extract_strided_slice %65 {offsets = [0, 0], sizes = [2, 128], strides = [1, 1]} : vector<2x512xf32> to vector<2x128xf32>
    %67 = vector.extract_strided_slice %65 {offsets = [0, 128], sizes = [2, 128], strides = [1, 1]} : vector<2x512xf32> to vector<2x128xf32>
    %68 = vector.extract_strided_slice %65 {offsets = [0, 256], sizes = [2, 128], strides = [1, 1]} : vector<2x512xf32> to vector<2x128xf32>
    %69 = vector.extract_strided_slice %65 {offsets = [0, 384], sizes = [2, 128], strides = [1, 1]} : vector<2x512xf32> to vector<2x128xf32>
    %c1_38 = arith.constant 1 : index
    %c0_39 = arith.constant 0 : index
    %70 = vector.load %arg7[%c1_38, %c0_39] : memref<2x512xf32, #tpu.memory_space<vmem>>, vector<1x128xf32>
    %c1_40 = arith.constant 1 : index
    %c128 = arith.constant 128 : index
    %71 = vector.load %arg7[%c1_40, %c128] : memref<2x512xf32, #tpu.memory_space<vmem>>, vector<1x128xf32>
    %c1_41 = arith.constant 1 : index
    %c256 = arith.constant 256 : index
    %72 = vector.load %arg7[%c1_41, %c256] : memref<2x512xf32, #tpu.memory_space<vmem>>, vector<1x128xf32>
    %c1_42 = arith.constant 1 : index
    %c384 = arith.constant 384 : index
    %73 = vector.load %arg7[%c1_42, %c384] : memref<2x512xf32, #tpu.memory_space<vmem>>, vector<1x128xf32>
    %74 = vector.shape_cast %70 : vector<1x128xf32> to vector<1x128xf32>
    %75 = vector.broadcast %74 : vector<1x128xf32> to vector<2x128xf32>
    %76 = arith.cmpf ogt, %67, %66 : vector<2x128xf32>
    %77 = arith.select %76, %67, %66 : vector<2x128xi1>, vector<2x128xf32>
    %78 = vector.shape_cast %71 : vector<1x128xf32> to vector<1x128xf32>
    %79 = vector.broadcast %78 : vector<1x128xf32> to vector<2x128xf32>
    %80 = arith.select %76, %79, %75 : vector<2x128xi1>, vector<2x128xf32>
    %81 = arith.cmpf ogt, %68, %77 : vector<2x128xf32>
    %82 = arith.select %81, %68, %77 : vector<2x128xi1>, vector<2x128xf32>
    %83 = vector.shape_cast %72 : vector<1x128xf32> to vector<1x128xf32>
    %84 = vector.broadcast %83 : vector<1x128xf32> to vector<2x128xf32>
    %85 = arith.select %81, %84, %80 : vector<2x128xi1>, vector<2x128xf32>
    %86 = arith.cmpf ogt, %69, %82 : vector<2x128xf32>
    %87 = vector.shape_cast %73 : vector<1x128xf32> to vector<1x128xf32>
    %88 = vector.broadcast %87 : vector<1x128xf32> to vector<2x128xf32>
    %89 = arith.select %86, %88, %85 : vector<2x128xi1>, vector<2x128xf32>
    %c0_43 = arith.constant 0 : index
    %c0_44 = arith.constant 0 : index
    %90 = vector.load %arg11[%c0_43, %c0_44] : memref<2x128xf32, #tpu.memory_space<vmem>>, vector<2x128xf32>
    tpu.vector_store %arg11[%c0_43, %c0_44], %89 {strides = array<i32>} : memref<2x128xf32, #tpu.memory_space<vmem>>, vector<2x128xf32>,
    %c0_45 = arith.constant 0 : index
    %c0_46 = arith.constant 0 : index
    %91 = vector.load %arg8[%c0_45, %c0_46] : memref<1x128xf32, #tpu.memory_space<vmem>>, vector<1x128xf32>
    %c0_47 = arith.constant 0 : index
    %c0_48 = arith.constant 0 : index
    %92 = vector.load %arg9[%c0_47, %c0_48] : memref<128x128xf32, #tpu.memory_space<vmem>>, vector<128x128xf32>
    %cst_49 = arith.constant dense<0.000000e+00> : vector<2x128xf32>
    %93 = tpu.matmul %89, %92, %cst_49 {dimension_numbers = #tpu.dot_dimension_numbers<[1], [0], [0], [1], [0, 0, 1, 1], [], []>} : vector<2x128xf32>, vector<128x128xf32>, vector<2x128xf32> -> vector<2x128xf32>
    %94 = vector.broadcast %91 : vector<1x128xf32> to vector<2x128xf32>
    %95 = arith.addf %94, %93 : vector<2x128xf32>
    %cst_50 = arith.constant 0.000000e+00 : f32
    %96 = vector.broadcast %cst_50 : f32 to vector<2x128xf32>
    %97 = arith.maximumf %95, %96 : vector<2x128xf32>
    %c0_51 = arith.constant 0 : index
    %c0_52 = arith.constant 0 : index
    %98 = vector.load %arg10[%c0_51, %c0_52] : memref<2x128xf32, #tpu.memory_space<vmem>>, vector<2x128xf32>
    tpu.vector_store %arg10[%c0_51, %c0_52], %97 {strides = array<i32>} : memref<2x128xf32, #tpu.memory_space<vmem>>, vector<2x128xf32>,
    return
  }
  func.func @transform_0(%arg0: i32) -> (i32, i32) {
    %c0_i32 = arith.constant 0 : i32
    %c0_i32_0 = arith.constant 0 : i32
    return %arg0, %c0_i32 : i32, i32
  }
  func.func @transform_1(%arg0: i32) -> (i32, i32) {
    %c0_i32 = arith.constant 0 : i32
    %c0_i32_0 = arith.constant 0 : i32
    %c0_i32_1 = arith.constant 0 : i32
    return %c0_i32, %c0_i32_0 : i32, i32
  }
  func.func @transform_2(%arg0: i32) -> (i32, i32) {
    %c0_i32 = arith.constant 0 : i32
    %c0_i32_0 = arith.constant 0 : i32
    %c0_i32_1 = arith.constant 0 : i32
    return %c0_i32, %c0_i32_0 : i32, i32
  }
  func.func @transform_3(%arg0: i32) -> (i32, i32, i32) {
    %c0_i32 = arith.constant 0 : i32
    %c0_i32_0 = arith.constant 0 : i32
    %c0_i32_1 = arith.constant 0 : i32
    %c0_i32_2 = arith.constant 0 : i32
    return %c0_i32, %c0_i32_0, %c0_i32_1 : i32, i32, i32
  }
  func.func @transform_4(%arg0: i32) -> (i32, i32) {
    %c0_i32 = arith.constant 0 : i32
    %c0_i32_0 = arith.constant 0 : i32
    %c0_i32_1 = arith.constant 0 : i32
    return %c0_i32, %c0_i32_0 : i32, i32
  }
  func.func @transform_5(%arg0: i32) -> (i32, i32) {
    %c0_i32 = arith.constant 0 : i32
    %c0_i32_0 = arith.constant 0 : i32
    %c0_i32_1 = arith.constant 0 : i32
    return %c0_i32, %c0_i32_0 : i32, i32
  }
  func.func @transform_6(%arg0: i32) -> (i32, i32) {
    %c0_i32 = arith.constant 0 : i32
    %c0_i32_0 = arith.constant 0 : i32
    %c0_i32_1 = arith.constant 0 : i32
    return %c0_i32, %c0_i32_0 : i32, i32
  }
  func.func @transform_7(%arg0: i32) -> (i32, i32) {
    %c0_i32 = arith.constant 0 : i32
    %c0_i32_0 = arith.constant 0 : i32
    %c0_i32_1 = arith.constant 0 : i32
    return %c0_i32, %c0_i32_0 : i32, i32
  }
  func.func @transform_8(%arg0: i32) -> (i32, i32) {
    %c0_i32 = arith.constant 0 : i32
    %c0_i32_0 = arith.constant 0 : i32
    %c0_i32_1 = arith.constant 0 : i32
    return %c0_i32, %c0_i32_0 : i32, i32
  }
  func.func @transform_9(%arg0: i32) -> (i32, i32) {
    %c0_i32 = arith.constant 0 : i32
    %c0_i32_0 = arith.constant 0 : i32
    return %arg0, %c0_i32 : i32, i32
  }
  func.func @transform_10(%arg0: i32) -> (i32, i32) {
    %c0_i32 = arith.constant 0 : i32
    %c0_i32_0 = arith.constant 0 : i32
    return %arg0, %c0_i32 : i32, i32
  }
}

</mosaic_0001>

<bundles_post_ra>
// kernel: tpu_custom_call.1
= control target key start
LH: loop header
LB: loop body
LE: loop exit
PB: predicated region body
PF: predicated region fallthrough
CT: control target
= control target key end

     0   :  { %16 = vsyncpa [#allocation3], 0  ;;  %s1714_s0 = inlined_call_operand.hbm [shape: f32[2,16], index: 0, kind: input, shape index: {}]   ;;  %s1715_s1 = inlined_call_operand.vmem [shape: f32[2,16], index: 1, kind: input, shape index: {}]   ;;  %s1716_s2 = inlined_call_operand.hbm [shape: bf16[16,128], index: 2, kind: input, shape index: {}]   ;;  %s1717_s3 = inlined_call_operand.hbm [shape: bf16[3,128,128], index: 3, kind: input, shape index: {}]   ;;  %s1718_s4 = inlined_call_operand.hbm [shape: bf16[128,512], index: 4, kind: input, shape index: {}]   ;;  %s1719_s5 = inlined_call_operand.vmem [shape: f32[4,128], index: 5, kind: input, shape index: {}]   ;;  %s1720_s6 = inlined_call_operand.vmem [shape: f32[2,512], index: 6, kind: input, shape index: {}]   ;;  %s1721_s7 = inlined_call_operand.vmem [shape: f32[1,128], index: 7, kind: input, shape index: {}]   ;;  %s1722_s8 = inlined_call_operand.hbm [shape: f32[128,128], index: 8, kind: input, shape index: {}]   ;;  %s1723_s9 = inlined_call_operand.hbm [shape: f32[2,128], index: 9, kind: output, shape index: {0}]   ;;  %s1724_s10 = inlined_call_operand.hbm [shape: f32[2,128], index: 10, kind: output, shape index: {1}]  }
   0x1   :  { %17 = vsyncpa [#allocation6], 0 }
   0x2   :  { %18 = vsyncpa [#allocation9], 0 }
   0x3   :  { %19 = vsyncpa [#allocation4], 0 }
   0x4   :  { %20 = vsyncpa [#allocation13], 0  ;;  %s1474_s13 = smov [#allocation5]   ;;  %s1310_s17 = scalar_lea.hbm %s1716_s2, 128 }
   0x5   :  { %s38_s14 = sshll.u32 %s1474_s13, 4  ;;  %p1311_p0 = scmp.ne.s32.totalorder %s1716_s2, %s1310_s17  ;;  %s39_s14 = int_to_ptr.vmem [resolvable:$true] %s38_s14 }
   0x6   :  { %p1314_p1 = scmp.lt.u32.totalorder %s1310_s17, %s1716_s2 }
   0x8   :  { %p1316_p2 = pnand %p1314_p1, %p1311_p0 }
   0xa   :  { %1319 = shalt.err (!%p1316_p2)
}
   0xb   :  { %s1320_s22 = scalar_lea.vmem %s39_s14, 128  ;;  %p1325_p4 = scmp.lt.s32.totalorder %s39_s14, %s39_s14 }
   0xc   :  { %p1321_p3 = scmp.ne.s32.totalorder %s39_s14, %s1320_s22  ;;  %p1326_p5 = scmp.lt.s32.totalorder %s1320_s22, %s1320_s22 }
   0xe   :  { %p1327_p6 = por %p1326_p5, %p1325_p4 }
  0x10   :  { %p1328_p7 = pnand %p1327_p6, %p1321_p3 }
  0x12   :  { %1331 = shalt.err (!%p1328_p7)
}
  0x13   :  { %s1475_s23 = smov 64   ;;  %s1476_s24 = smov 4  }
  0x14   :  { %44 = dma.hbm_to_vmem [thread:$0]  %s1716_s2, 128, %s39_s14, [#allocation6], %s1475_s23, %s1475_s23, %s1476_s24  }
  0x15   :  { %s1477_s27 = smov [#allocation8]   ;;  %s1332_s11 = scalar_lea.hbm %s1718_s4, 4096 }
  0x16   :  { %s62_s28 = sshll.u32 %s1477_s27, 4  ;;  %p1333_p8 = scmp.ne.s32.totalorder %s1718_s4, %s1332_s11  ;;  %s63_s28 = int_to_ptr.vmem [resolvable:$true] %s62_s28 }
  0x17   :  { %p1336_p9 = scmp.lt.u32.totalorder %s1332_s11, %s1718_s4 }
  0x19   :  { %p1338_p10 = pnand %p1336_p9, %p1333_p8 }
  0x1b   :  { %1341 = shalt.err (!%p1338_p10)
}
  0x1c   :  { %s1342_s17 = scalar_lea.vmem %s63_s28, 4096  ;;  %p1347_p12 = scmp.lt.s32.totalorder %s63_s28, %s63_s28 }
  0x1d   :  { %p1343_p11 = scmp.ne.s32.totalorder %s63_s28, %s1342_s17  ;;  %p1348_p13 = scmp.lt.s32.totalorder %s1342_s17, %s1342_s17 }
  0x1f   :  { %p1349_p0 = por %p1348_p13, %p1347_p12 }
  0x21   :  { %p1350_p1 = pnand %p1349_p0, %p1343_p11 }
  0x23   :  { %1353 = shalt.err (!%p1350_p1)
}
  0x24   :  { %s1478_s2 = smov 256   ;;  %s1479_s14 = smov 16  }
  0x25   :  { %68 = dma.hbm_to_vmem [thread:$0]  %s1718_s4, 4096, %s63_s28, [#allocation9], %s1478_s2, %s1478_s2, %s1479_s14  }
  0x26   :  { %s1480_s20 = smov [#allocation2]   ;;  %s1481_s22 = smov [#allocation7]  }
  0x27   :  { %s27_s21 = sshll.u32 %s1480_s20, 4  ;;  %s50_s25 = sshll.u32 %s1481_s22, 4  ;;  %s28_s21 = int_to_ptr.vmem [resolvable:$true] %s27_s21  ;;  %s1573_s25 = int_to_ptr.vmem [resolvable:$true] %s50_s25 }
  0x28   :  { %s1354_s29 = scalar_lea.hbm %s1714_s0, 32 }
  0x29   :  { %p1355_p2 = scmp.ne.s32.totalorder %s1714_s0, %s1354_s29  ;;  %p1358_p3 = scmp.lt.u32.totalorder %s1354_s29, %s1714_s0 }
  0x2b   :  { %p1360_p4 = pnand %p1358_p3, %p1355_p2 }
  0x2d   :  { %1363 = shalt.err (!%p1360_p4)
}
  0x2e   :  { %s1364_s4 = scalar_lea.vmem %s28_s21, 32  ;;  %p1369_p6 = scmp.lt.s32.totalorder %s28_s21, %s28_s21 }
  0x2f   :  { %p1365_p5 = scmp.ne.s32.totalorder %s28_s21, %s1364_s4  ;;  %p1370_p7 = scmp.lt.s32.totalorder %s1364_s4, %s1364_s4 }
  0x31   :  { %p1371_p8 = por %p1370_p7, %p1369_p6 }
  0x33   :  { %p1372_p9 = pnand %p1371_p8, %p1365_p5 }
  0x35   :  { %1375 = shalt.err (!%p1372_p9)
}
  0x36   :  { %30 = dma.hbm_to_vmem [thread:$0]  %s1714_s0, 32, %s28_s21, [#allocation3]  }
  0x37   :  { %s1376_s2 = scalar_lea.hbm %s1717_s3, 3072 }
  0x38   :  { %p1377_p10 = scmp.ne.s32.totalorder %s1717_s3, %s1376_s2  ;;  %p1380_p11 = scmp.lt.u32.totalorder %s1376_s2, %s1717_s3 }
  0x3a   :  { %p1382_p12 = pnand %p1380_p11, %p1377_p10 }
  0x3c   :  { %1385 = shalt.err (!%p1382_p12)
}
  0x3d   :  { %s1386_s22 = scalar_lea.vmem %s1573_s25, 3072  ;;  %p1391_p0 = scmp.lt.s32.totalorder %s1573_s25, %s1573_s25 }
  0x3e   :  { %p1387_p13 = scmp.ne.s32.totalorder %s1573_s25, %s1386_s22  ;;  %p1392_p1 = scmp.lt.s32.totalorder %s1386_s22, %s1386_s22 }
  0x40   :  { %p1393_p2 = por %p1392_p1, %p1391_p0 }
  0x42   :  { %p1394_p3 = pnand %p1393_p2, %p1387_p13 }
  0x44   :  { %1397 = shalt.err (!%p1394_p3)
}
  0x45   :  { %56 = dma.hbm_to_vmem [thread:$0]  %s1717_s3, 3072, %s1573_s25, [#allocation6], %s1475_s23, %s1475_s23, %s1476_s24  }
  0x46   :  { %s1482_s26 = smov [#allocation10]   ;;  %s1398_s11 = scalar_lea.hbm %s1722_s8, 2048 }
  0x47   :  { %s80_s27 = sshll.u32 %s1482_s26, 4  ;;  %p1399_p4 = scmp.ne.s32.totalorder %s1722_s8, %s1398_s11  ;;  %s81_s27 = int_to_ptr.vmem [resolvable:$true] %s80_s27 }
  0x48   :  { %p1402_p5 = scmp.lt.u32.totalorder %s1398_s11, %s1722_s8 }
  0x4a   :  { %p1404_p6 = pnand %p1402_p5, %p1399_p4 }
  0x4c   :  { %1407 = shalt.err (!%p1404_p6)
}
  0x4d   :  { %s1408_s15 = scalar_lea.vmem %s81_s27, 2048  ;;  %p1413_p8 = scmp.lt.s32.totalorder %s81_s27, %s81_s27 }
  0x4e   :  { %p1409_p7 = scmp.ne.s32.totalorder %s81_s27, %s1408_s15  ;;  %p1414_p9 = scmp.lt.s32.totalorder %s1408_s15, %s1408_s15 }
  0x50   :  { %p1415_p10 = por %p1414_p9, %p1413_p8 }
  0x52   :  { %p1416_p11 = pnand %p1415_p10, %p1409_p7 }
  0x54   :  { %1419 = shalt.err (!%p1416_p11)
}
  0x55   :  { %s1483_s3 = smov 128   ;;  %s1484_s23 = smov 8  }
  0x56   :  { %86 = dma.hbm_to_vmem [thread:$0]  %s1722_s8, 2048, %s81_s27, [#allocation9], %s1483_s3, %s1483_s3, %s1484_s23  }
  0x57   :  { %1464 = dma.done.wait [#allocation3], 32  }
  0x58   :  { %1465 = vsyncadd [#allocation3], 4294967264 }
  0x59   :  { %1466 = dma.done.wait [#allocation6], 3200  }
  0x5a   :  { %1467 = vsyncadd [#allocation6], 4294964096 }
  0x5b   :  { %1468 = dma.done.wait [#allocation9], 6144  }
  0x5c   :  { %1469 = vsyncadd [#allocation9], 4294961152  ;;  %vm104_vm0 = vcmask 123904   ;;  %v103_v0 = vld [vmem:[#allocation2] sm:$0x3]  ;;  %v1235_v7 = vld [vmem:[#allocation5] sm:$0xff]  }
  0x5d   :  { %v105_v1 = vsel %vm104_vm0, %v103_v0, 0.0  ;;  %v1485_v8 = vmov 0.0   ;;  %vm1486_vm1 = vmmov 0   ;;  %v1236_v9 = vld [vmem:[#allocation7] sm:$0xff]   ;;  %v1237_v10 = vld [vmem:[#allocation7 + $0x8] sm:$0xff]   ;;  %v1238_v11 = vld [vmem:[#allocation7 + $0x10] sm:$0xff]  }
  0x5e   :  { %106 = vadd.xlane.f32.xlu0 %v105_v1  ;;  %1093 = vmatprep.subr.bf16.mxu0 %v1485_v8  ;;  %v1239_v12 = vld [vmem:[#allocation7 + $0x18] sm:$0xff]   ;;  %v1240_v13 = vld [vmem:[#allocation7 + $0x20] sm:$0xff]   ;;  %v1241_v14 = vld [vmem:[#allocation7 + $0x28] sm:$0xff]   ;;  %vm145_vm2 = vcmask 130048   ;;  %s1489_s15 = smov [#allocation12]  }
  0x5f   :  { %1095 = vmatprep.mubr.msk.bf16.mxu0 %vm1486_vm1, %v1485_v8  ;;  %1094 = vmatpush3.bf16.msra.mxu0 %v1235_v7  ;;  %v978_v19 = vld [vmem:[%s1715_s1] ss:$0 sm:$0xff]  ;;  %v979_v21 = vld [vmem:[%s1715_s1 + $0x1] ss:$0 sm:$0xff]  ;;  %v1242_v25 = vld [vmem:[#allocation7 + $0x30] sm:$0xff]   ;;  %s963_s3 = sshll.u32 %s1489_s15, 4  ;;  %s964_s3 = int_to_ptr.vmem [resolvable:$true] %s963_s3 }
  0x60   :  { %1099 = vmatprep.subr.bf16.mxu1 %v1485_v8  ;;  %1115 = vmatprep.mubr.msk.bf16.mxu1 %vm1486_vm1, %v1485_v8  ;;  %v1243_v26 = vld [vmem:[#allocation7 + $0x38] sm:$0xff]   ;;  %v1244_v27 = vld [vmem:[#allocation7 + $0x40] sm:$0xff]   ;;  %v1245_v28 = vld [vmem:[#allocation7 + $0x48] sm:$0xff]   ;;  %s1420_s23 = scalar_lea.vmem %s964_s3, 32  ;;  %p1425_p13 = scmp.lt.s32.totalorder %s964_s3, %s964_s3 }
  0x61   :  { %1119 = vmatprep.subr.bf16.mxu0 %v1485_v8  ;;  %1100 = vmatpush3.bf16.msra.mxu1 %v1236_v9  ;;  %v1246_v29 = vld [vmem:[#allocation7 + $0x50] sm:$0xff]   ;;  %v1247_v30 = vld [vmem:[#allocation7 + $0x58] sm:$0xff]   ;;  %v1248_v31 = vld [vmem:[#allocation7 + $0x60] sm:$0xff]   ;;  %p1421_p12 = scmp.ne.s32.totalorder %s964_s3, %s1420_s23  ;;  %p1426_p0 = scmp.lt.s32.totalorder %s1420_s23, %s1420_s23 }
  0x62   :  { %1101 = vmatprep.subr.bf16.mxu1 %v1485_v8  ;;  %v1249_v32 = vld [vmem:[#allocation7 + $0x68] sm:$0xff]   ;;  %v980_v33 = vld [vmem:[%s1719_s5] ss:$0 sm:$0xff]  ;;  %v1250_v41 = vld [vmem:[#allocation7 + $0x70] sm:$0xff]  }
  0x63   :  { %v1251_v42 = vld [vmem:[#allocation7 + $0x78] sm:$0xff]   ;;  %v1252_v43 = vld [vmem:[#allocation7 + $0x80] sm:$0xff]   ;;  %v1253_v44 = vld [vmem:[#allocation7 + $0x88] sm:$0xff]   ;;  %p1427_p1 = por %p1426_p0, %p1425_p13 }
  0x64   :  { %v1254_v45 = vld [vmem:[#allocation7 + $0x90] sm:$0xff]   ;;  %v1255_v46 = vld [vmem:[#allocation7 + $0x98] sm:$0xff]   ;;  %v1256_v47 = vld [vmem:[#allocation7 + $0xa0] sm:$0xff]  }
  0x65   :  { %1102 = vmatpush3.bf16.msra.mxu1 %v1237_v10  ;;  %v1257_v48 = vld [vmem:[#allocation7 + $0xa8] sm:$0xff]   ;;  %v983_v49 = vld [vmem:[%s1719_s5 + $0x1] ss:$0 sm:$0xff]  ;;  %v1258_v57 = vld [vmem:[#allocation7 + $0xb0] sm:$0xff]   ;;  %p1428_p2 = pnand %p1427_p1, %p1421_p12 }
  0x66   :  { %1103 = vmatprep.subr.bf16.mxu1 %v1485_v8  ;;  %v1259_v58 = vld [vmem:[#allocation7 + $0xb8] sm:$0xff]   ;;  %v1260_v59 = vld [vmem:[#allocation8] ss:$16 sps:$4 sm:$0xff]   ;;  %v1262_v60 = vld [vmem:[#allocation8 + $0x4] ss:$16 sps:$4 sm:$0xff]  }
  0x67   :  { %v1265_v61 = vld [vmem:[#allocation8 + $0xc] ss:$16 sps:$4 sm:$0xff]   ;;  %v1268_v62 = vld [vmem:[#allocation8 + $0x24] ss:$16 sps:$4 sm:$0xff]   ;;  %v1266_v63 = vld [vmem:[#allocation8 + $0x20] ss:$16 sps:$4 sm:$0xff]  }
  0x68   :  { %v1272_v1 = vld [vmem:[#allocation8 + $0x40] ss:$16 sps:$4 sm:$0xff]   ;;  %v1298_v9 = vld [vmem:[#allocation8 + $0xc4] ss:$16 sps:$4 sm:$0xff]  }
  0x69   :  { %1104 = vmatpush3.bf16.msra.mxu1 %v1238_v11  ;;  %v1290_v7 = vld [vmem:[#allocation8 + $0xa0] ss:$16 sps:$4 sm:$0xff]   ;;  %v992_v11 = vld [vmem:[%s1719_s5 + $0x2] ss:$0 sm:$0xff] }
  0x6a   :  { %1105 = vmatprep.subr.bf16.mxu1 %v1485_v8  ;;  %v1296_v10 = vld [vmem:[#allocation8 + $0xc0] ss:$16 sps:$4 sm:$0xff]  }
  0x6d   :  { %1106 = vmatpush3.bf16.msra.mxu1 %v1239_v12 }
  0x6e   :  { %1107 = vmatprep.subr.bf16.mxu1 %v1485_v8 }
  0x71   :  { %1108 = vmatpush3.bf16.msra.mxu1 %v1240_v13 }
  0x72   :  { %1109 = vmatprep.subr.bf16.mxu1 %v1485_v8 }
  0x75   :  { %1110 = vmatpush3.bf16.msra.mxu1 %v1241_v14 }
  0x76   :  { %1111 = vmatprep.subr.bf16.mxu1 %v1485_v8 }
  0x79   :  { %1112 = vmatpush3.bf16.msra.mxu1 %v1242_v25  ;;  %v1281_v25 = vld [vmem:[#allocation8 + $0x68] ss:$16 sps:$4 sm:$0xff]  }
  0x7a   :  { %1113 = vmatprep.subr.bf16.mxu1 %v1485_v8 }
  0x7d   :  { %1114 = vmatpush3.bf16.msra.mxu1 %v1243_v26  ;;  %v1289_v26 = vld [vmem:[#allocation8 + $0x8c] ss:$16 sps:$4 sm:$0xff]  }
  0x7e   :  { %1139 = vmatprep.subr.bf16.mxu1 %v1485_v8 }
  0xeb   :  { %v107_v2 = vpop.xlane.xlu0 %106 }
  0xec   :  { %v109_v3 = vmul.f32 0.0625, %v107_v2  ;;  %v1280_v2 = vld [vmem:[#allocation8 + $0x64] ss:$16 sps:$4 sm:$0xff]  }
  0xee   :  { %v110_v4 = vsub.f32 %v103_v0, %v109_v3  ;;  %v1274_v0 = vld [vmem:[#allocation8 + $0x44] ss:$16 sps:$4 sm:$0xff]   ;;  %v1278_v3 = vld [vmem:[#allocation8 + $0x60] ss:$16 sps:$4 sm:$0xff]  }
  0xf0   :  { %v111_v5 = vmul.f32 %v110_v4, %v110_v4 }
  0xf2   :  { %v112_v6 = vsel %vm104_vm0, %v111_v5, 0.0  ;;  %v1284_v5 = vld [vmem:[#allocation8 + $0x80] ss:$16 sps:$4 sm:$0xff]  }
  0xf3   :  { %113 = vadd.xlane.f32.xlu0 %v112_v6  ;;  %v1292_v6 = vld [vmem:[#allocation8 + $0xa4] ss:$16 sps:$4 sm:$0xff]  }
 0x180   :  { %v114_v15 = vpop.xlane.xlu0 %113 }
 0x181   :  { %v115_v16 = vmul.f32 0.0625, %v114_v15 }
 0x183   :  { %v116_v17 = vadd.f32 1e-05, %v115_v16 }
 0x185   :  { %1308 = vrsqrt.f32 %v116_v17 }
 0x18f   :  { %v1309_v18 = vpop.eup %1308 }
 0x190   :  { %v118_v20 = vmul.f32 %v1309_v18, %v110_v4  ;;  %v1286_v4 = vld [vmem:[#allocation8 + $0x84] ss:$16 sps:$4 sm:$0xff]   ;;  %v1263_v18 = vld [vmem:[#allocation8 + $0x8] ss:$16 sps:$4 sm:$0xff]  }
 0x192   :  { %v124_v22 = vmul.f32 %v978_v19, %v118_v20  ;;  %v1271_v20 = vld [vmem:[#allocation8 + $0x2c] ss:$16 sps:$4 sm:$0xff]  }
 0x194   :  { %v130_v23 = vadd.f32 %v979_v21, %v124_v22  ;;  %v1269_v21 = vld [vmem:[#allocation8 + $0x28] ss:$16 sps:$4 sm:$0xff]   ;;  %v1277_v22 = vld [vmem:[#allocation8 + $0x4c] ss:$16 sps:$4 sm:$0xff]  }
 0x196   :  { %v131_v24 = vpack.c.bf16 %v130_v23, %v130_v23  ;;  %v1275_v23 = vld [vmem:[#allocation8 + $0x48] ss:$16 sps:$4 sm:$0xff]  }
 0x198   :  { %1096 = vmatmul.mubr.msk.bf16.vlgmr.msra.gmra.mrb[0].mxu0 %vm145_vm2, %v131_v24  ;;  %v1283_v24 = vld [vmem:[#allocation8 + $0x6c] ss:$16 sps:$4 sm:$0xff]  }
 0x199   :  { %1135 = vmatprep.mubr.msk.bf16.mxu0 %vm1486_vm1, %v1485_v8  ;;  %1120 = vmatpush3.bf16.msra.mxu0 %v1244_v27  ;;  %v1287_v27 = vld [vmem:[#allocation8 + $0x88] ss:$16 sps:$4 sm:$0xff]  }
 0x19a   :  { %1121 = vmatprep.subr.bf16.mxu0 %v1485_v8 }
 0x19d   :  { %1122 = vmatpush3.bf16.msra.mxu0 %v1245_v28  ;;  %v1295_v28 = vld [vmem:[#allocation8 + $0xac] ss:$16 sps:$4 sm:$0xff]  }
 0x19e   :  { %1123 = vmatprep.subr.bf16.mxu0 %v1485_v8 }
 0x1a1   :  { %1124 = vmatpush3.bf16.msra.mxu0 %v1246_v29  ;;  %v1293_v29 = vld [vmem:[#allocation8 + $0xa8] ss:$16 sps:$4 sm:$0xff]  }
 0x1a2   :  { %1125 = vmatprep.subr.bf16.mxu0 %v1485_v8 }
 0x1a5   :  { %1126 = vmatpush3.bf16.msra.mxu0 %v1247_v30  ;;  %v1301_v30 = vld [vmem:[#allocation8 + $0xcc] ss:$16 sps:$4 sm:$0xff]  }
 0x1a6   :  { %1127 = vmatprep.subr.bf16.mxu0 %v1485_v8 }
 0x1a9   :  { %1128 = vmatpush3.bf16.msra.mxu0 %v1248_v31  ;;  %v1299_v31 = vld [vmem:[#allocation8 + $0xc8] ss:$16 sps:$4 sm:$0xff]  }
 0x1aa   :  { %1129 = vmatprep.subr.bf16.mxu0 %v1485_v8 }
 0x1ad   :  { %1130 = vmatpush3.bf16.msra.mxu0 %v1249_v32  ;;  %v1304_v32 = vld [vmem:[#allocation8 + $0xe4] ss:$16 sps:$4 sm:$0xff]  }
 0x1ae   :  { %1131 = vmatprep.subr.bf16.mxu0 %v1485_v8 }
 0x1b1   :  { %1132 = vmatpush3.bf16.msra.mxu0 %v1250_v41 }
 0x1b2   :  { %1133 = vmatprep.subr.bf16.mxu0 %v1485_v8 }
 0x1b5   :  { %1134 = vmatpush3.bf16.msra.mxu0 %v1251_v42  ;;  %v852_v42 = vld [vmem:[#allocation10] sm:$0xff] }
 0x1b6   :  { %740 = vmatprep.subr.bf16.mxu0 %v1262_v60 }
 0x26b   :  { %v183_v34 = vpop.f32.mrb[0].mxu0 }
 0x26c   :  { %v184_v35 = vadd.f32 %v980_v33, %v183_v34  ;;  %v1097_v36 = vpop.f32.mrb[1].mxu0  ;;  %v1307_v33 = vld [vmem:[#allocation8 + $0xec] ss:$16 sps:$4 sm:$0xff]   ;;  %v1302_v34 = vld [vmem:[#allocation8 + $0xe0] ss:$16 sps:$4 sm:$0xff]  }
 0x26d   :  { %v186_v37 = vpop.f32.mrb[2].mxu0  ;;  %v1487_v36 = vmov 0  }
 0x26e   :  { %v189_v38 = vmax.f32 %v184_v35, 0.0  ;;  %v1098_v39 = vpop.f32.mrb[3].mxu0  ;;  %v1305_v35 = vld [vmem:[#allocation8 + $0xe8] ss:$16 sps:$4 sm:$0xff]   ;;  %v1488_v37 = vmov 0.0|0.0  }
 0x270   :  { %v190_v40 = vpack.c.bf16 %v189_v38, %v189_v38  ;;  %v1001_v38 = vld [vmem:[%s1719_s5 + $0x3] ss:$0 sm:$0xff] }
 0x272   :  { %1116 = vmatmul.mubr.bf16.vlgmr.msra.gmra.mrb[0].mxu1 %v190_v40 }
 0x273   :  { %1155 = vmatprep.mubr.msk.bf16.mxu1 %vm1486_vm1, %v1485_v8  ;;  %1140 = vmatpush3.bf16.msra.mxu1 %v1252_v43  ;;  %v853_v43 = vld [vmem:[#allocation10 + $0x8] sm:$0xff] }
 0x274   :  { %1141 = vmatprep.subr.bf16.mxu1 %v1485_v8 }
 0x277   :  { %1142 = vmatpush3.bf16.msra.mxu1 %v1253_v44 }
 0x278   :  { %1143 = vmatprep.subr.bf16.mxu1 %v1485_v8 }
 0x27b   :  { %1144 = vmatpush3.bf16.msra.mxu1 %v1254_v45 }
 0x27c   :  { %1145 = vmatprep.subr.bf16.mxu1 %v1485_v8 }
 0x27f   :  { %1146 = vmatpush3.bf16.msra.mxu1 %v1255_v46 }
 0x280   :  { %1147 = vmatprep.subr.bf16.mxu1 %v1485_v8 }
 0x283   :  { %1148 = vmatpush3.bf16.msra.mxu1 %v1256_v47  ;;  %v1195_v47 = vpack.c.bf16 %v853_v43, %v852_v42 }
 0x284   :  { %1149 = vmatprep.subr.bf16.mxu1 %v1485_v8 }
 0x287   :  { %1150 = vmatpush3.bf16.msra.mxu1 %v1257_v48 }
 0x288   :  { %1151 = vmatprep.subr.bf16.mxu1 %v1485_v8 }
 0x28b   :  { %1152 = vmatpush3.bf16.msra.mxu1 %v1258_v57 }
 0x28c   :  { %1153 = vmatprep.subr.bf16.mxu1 %v1485_v8 }
 0x28f   :  { %1154 = vmatpush3.bf16.msra.mxu1 %v1259_v58  ;;  %v860_v58 = vld [vmem:[#allocation10 + $0x40] sm:$0xff] }
 0x290   :  { %781 = vmatprep.subr.bf16.mxu1 %v1265_v61  ;;  %v862_v61 = vld [vmem:[#allocation10 + $0x50] sm:$0xff] }
 0x345   :  { %v294_v50 = vpop.f32.mrb[0].mxu1 }
 0x346   :  { %v295_v51 = vadd.f32 %v983_v49, %v294_v50  ;;  %v1117_v52 = vpop.f32.mrb[1].mxu1  ;;  %v854_v49 = vld [vmem:[#allocation10 + $0x10] sm:$0xff]  ;;  %v855_v50 = vld [vmem:[#allocation10 + $0x18] sm:$0xff] }
 0x347   :  { %v297_v53 = vpop.f32.mrb[2].mxu1  ;;  %v856_v52 = vld [vmem:[#allocation10 + $0x20] sm:$0xff] }
 0x348   :  { %v300_v54 = vmax.f32 %v295_v51, 0.0  ;;  %v1118_v55 = vpop.f32.mrb[3].mxu1  ;;  %v1198_v51 = vpack.c.bf16 %v855_v50, %v854_v49  ;;  %v857_v53 = vld [vmem:[#allocation10 + $0x28] sm:$0xff] }
 0x349   :  { %v858_v55 = vld [vmem:[#allocation10 + $0x30] sm:$0xff] }
 0x34a   :  { %v301_v56 = vpack.c.bf16 %v300_v54, %v300_v54  ;;  %v1201_v54 = vpack.c.bf16 %v857_v53, %v856_v52 }
 0x34c   :  { %1136 = vmatmul.mubr.bf16.vlgmr.msra.gmra.mrb[4].mxu0 %v301_v56  ;;  %v859_v56 = vld [vmem:[#allocation10 + $0x38] sm:$0xff] }
 0x34d   :  { %741 = vmatpush1.bf16.msra.mxu0 %v1260_v59  ;;  %772 = vmatprep.mubr.bf16.mxu0 %v1487_v36  ;;  %v1204_v57 = vpack.c.bf16 %v859_v56, %v858_v55  ;;  %v861_v59 = vld [vmem:[#allocation10 + $0x48] sm:$0xff] }
 0x34e   :  { %742 = vmatprep.subr.bf16.mxu0 %v1268_v62  ;;  %v1207_v60 = vpack.c.bf16 %v861_v59, %v860_v58  ;;  %v863_v62 = vld [vmem:[#allocation10 + $0x58] sm:$0xff] }
 0x351   :  { %743 = vmatpush1.bf16.msra.mxu0 %v1266_v63  ;;  %v864_v63 = vld [vmem:[#allocation10 + $0x60] sm:$0xff] }
 0x352   :  { %744 = vmatprep.subr.bf16.mxu0 %v1274_v0  ;;  %v865_v0 = vld [vmem:[#allocation10 + $0x68] sm:$0xff] }
 0x355   :  { %745 = vmatpush1.bf16.msra.mxu0 %v1272_v1  ;;  %v1213_v1 = vpack.c.bf16 %v865_v0, %v864_v63 }
 0x356   :  { %746 = vmatprep.subr.bf16.mxu0 %v1280_v2  ;;  %v866_v2 = vld [vmem:[#allocation10 + $0x70] sm:$0xff] }
 0x359   :  { %747 = vmatpush1.bf16.msra.mxu0 %v1278_v3  ;;  %v867_v3 = vld [vmem:[#allocation10 + $0x78] sm:$0xff] }
 0x35a   :  { %748 = vmatprep.subr.bf16.mxu0 %v1286_v4  ;;  %v1216_v4 = vpack.c.bf16 %v867_v3, %v866_v2 }
 0x35d   :  { %749 = vmatpush1.bf16.msra.mxu0 %v1284_v5  ;;  %v560_v5 = vlaneseq }
 0x35e   :  { %750 = vmatprep.subr.bf16.mxu0 %v1292_v6 }
 0x35f   :  { %v561_v6 = vshrl.u32 %v560_v5, 7 }
 0x361   :  { %751 = vmatpush1.bf16.msra.mxu0 %v1290_v7  ;;  %v562_v7 = vsub.s32 0, %v561_v6 }
 0x362   :  { %752 = vmatprep.subr.bf16.mxu0 %v1298_v9  ;;  %v558_v9 = vld [vmem:[%s1720_s6] ss:$2 sm:$0xf] }
 0x365   :  { %753 = vmatpush1.bf16.msra.mxu0 %v1296_v10  ;;  %v566_v10 = vsub.s32 1, %v561_v6 }
 0x366   :  { %754 = vmatprep.subr.bf16.mxu0 %v1304_v32 }
 0x369   :  { %755 = vmatpush1.bf16.msra.mxu0 %v1302_v34  ;;  %v1045_v34 = vld [vmem:[%s1720_s6 + $0x7] ss:$0 sm:$0xff] }
 0x36a   :  { %1194 = vmatprep.subr.bf16.mxu0 %v1488_v37 }
 0x41f   :  { %v406_v12 = vpop.f32.mrb[4].mxu0 }
 0x420   :  { %v407_v13 = vadd.f32 %v992_v11, %v406_v12  ;;  %v1137_v14 = vpop.f32.mrb[5].mxu0  ;;  %v570_v11 = vsub.s32 2, %v561_v6  ;;  %v563_v12 = vrot.slane %v558_v9, %v562_v7 }
 0x421   :  { %v409_v15 = vpop.f32.mrb[6].mxu0  ;;  %v574_v14 = vsub.s32 3, %v561_v6 }
 0x422   :  { %v412_v16 = vmax.f32 %v407_v13, 0.0  ;;  %v1138_v17 = vpop.f32.mrb[7].mxu0  ;;  %v567_v13 = vrot.slane %v558_v9, %v566_v10 }
 0x424   :  { %v413_v19 = vpack.c.bf16 %v412_v16, %v412_v16  ;;  %v571_v16 = vrot.slane %v558_v9, %v570_v11 }
 0x426   :  { %1156 = vmatmul.mubr.bf16.vlgmr.msra.gmra.mrb[4].mxu1 %v413_v19 }
 0x427   :  { %782 = vmatpush1.bf16.msra.mxu1 %v1263_v18  ;;  %813 = vmatprep.mubr.bf16.mxu1 %v1487_v36 }
 0x428   :  { %783 = vmatprep.subr.bf16.mxu1 %v1271_v20 }
 0x42b   :  { %784 = vmatpush1.bf16.msra.mxu1 %v1269_v21 }
 0x42c   :  { %785 = vmatprep.subr.bf16.mxu1 %v1277_v22  ;;  %v1042_v22 = vld [vmem:[%s1720_s6 + $0x1] ss:$0 sm:$0xff] }
 0x42f   :  { %786 = vmatpush1.bf16.msra.mxu1 %v1275_v23  ;;  %v1043_v23 = vld [vmem:[%s1720_s6 + $0x3] ss:$0 sm:$0xff] }
 0x430   :  { %787 = vmatprep.subr.bf16.mxu1 %v1283_v24  ;;  %v575_v24 = vrot.slane %v558_v9, %v574_v14 }
 0x433   :  { %788 = vmatpush1.bf16.msra.mxu1 %v1281_v25 }
 0x434   :  { %789 = vmatprep.subr.bf16.mxu1 %v1289_v26 }
 0x437   :  { %790 = vmatpush1.bf16.msra.mxu1 %v1287_v27 }
 0x438   :  { %791 = vmatprep.subr.bf16.mxu1 %v1295_v28 }
 0x43b   :  { %792 = vmatpush1.bf16.msra.mxu1 %v1293_v29 }
 0x43c   :  { %793 = vmatprep.subr.bf16.mxu1 %v1301_v30  ;;  %v1044_v30 = vld [vmem:[%s1720_s6 + $0x5] ss:$0 sm:$0xff] }
 0x43f   :  { %794 = vmatpush1.bf16.msra.mxu1 %v1299_v31 }
 0x440   :  { %795 = vmatprep.subr.bf16.mxu1 %v1307_v33 }
 0x443   :  { %796 = vmatpush1.bf16.msra.mxu1 %v1305_v35 }
 0x4f9   :  { %v518_v39 = vpop.f32.mrb[4].mxu1 }
 0x4fa   :  { %v519_v40 = vadd.f32 %v1001_v38, %v518_v39  ;;  %v1157_v41 = vpop.f32.mrb[5].mxu1 }
 0x4fb   :  { %v521_v44 = vpop.f32.mrb[6].mxu1 }
 0x4fc   :  { %v524_v45 = vmax.f32 %v519_v40, 0.0  ;;  %v1158_v46 = vpop.f32.mrb[7].mxu1 }
 0x4fe   :  { %v525_v48 = vpack.c.bf16 %v524_v45, %v524_v45 }
 0x500   :  { %773 = vmatmul.mubr.bf16.vlgmr.msra.gmra.mrb[8].mxu0 %v525_v48  ;;  %814 = vmatmul.mubr.bf16.vlgmr.msra.gmra.mrb[8].mxu1 %v525_v48 }
 0x501   :  { %1196 = vmatpush3.bf16.msra.mxu0 %v1195_v47  ;;  %1191 = vmatprep.mubr.msk.f32.mxu0 %vm1486_vm1, %v1485_v8  ;;  %v1210_v8 = vpack.c.bf16 %v863_v62, %v862_v61 }
 0x502   :  { %1197 = vmatprep.subr.bf16.mxu0 %v1488_v37 }
 0x505   :  { %1199 = vmatpush3.bf16.msra.mxu0 %v1198_v51 }
 0x506   :  { %1200 = vmatprep.subr.bf16.mxu0 %v1488_v37 }
 0x509   :  { %1202 = vmatpush3.bf16.msra.mxu0 %v1201_v54 }
 0x50a   :  { %1203 = vmatprep.subr.bf16.mxu0 %v1488_v37 }
 0x50d   :  { %1205 = vmatpush3.bf16.msra.mxu0 %v1204_v57 }
 0x50e   :  { %1206 = vmatprep.subr.bf16.mxu0 %v1488_v37 }
 0x511   :  { %1208 = vmatpush3.bf16.msra.mxu0 %v1207_v60 }
 0x512   :  { %1209 = vmatprep.subr.bf16.mxu0 %v1488_v37 }
 0x515   :  { %1211 = vmatpush3.bf16.msra.mxu0 %v1210_v8 }
 0x516   :  { %1212 = vmatprep.subr.bf16.mxu0 %v1488_v37 }
 0x519   :  { %1214 = vmatpush3.bf16.msra.mxu0 %v1213_v1 }
 0x51a   :  { %1215 = vmatprep.subr.bf16.mxu0 %v1488_v37 }
 0x51d   :  { %1217 = vmatpush3.bf16.msra.mxu0 %v1216_v4 }
 0x5d3   :  { %v774_v15 = vpop.f32.mrb[8].mxu0  ;;  %v815_v17 = vpop.f32.mrb[8].mxu1 }
 0x5d4   :  { %v775_v18 = vadd.f32 %v774_v15, %v563_v12  ;;  %v776_v19 = vpop.f32.mrb[9].mxu0  ;;  %v817_v20 = vpop.f32.mrb[9].mxu1  ;;  %v816_v29 = vadd.f32 %v815_v17, %v571_v16 }
 0x5d5   :  { %v777_v21 = vadd.f32 %v776_v19, %v567_v13  ;;  %v778_v25 = vpop.f32.mrb[10].mxu0  ;;  %v819_v26 = vpop.f32.mrb[10].mxu1  ;;  %v818_v33 = vadd.f32 %v817_v20, %v575_v24 }
 0x5d6   :  { %v779_v27 = vpop.f32.mrb[11].mxu0  ;;  %v820_v28 = vpop.f32.mrb[11].mxu1 }
 0x5d7   :  { %vm830_vm3 = vcmp.gt.f32.partialorder %v777_v21, %v775_v18 }
 0x5d8   :  { %v831_v31 = vsel %vm830_vm3, %v777_v21, %v775_v18  ;;  %v836_v32 = vsel %vm830_vm3, %v1043_v23, %v1042_v22 }
 0x5d9   :  { %vm837_vm4 = vcmp.gt.f32.partialorder %v816_v29, %v831_v31 }
 0x5da   :  { %v838_v35 = vsel %vm837_vm4, %v816_v29, %v831_v31  ;;  %v843_v36 = vsel %vm837_vm4, %v1044_v30, %v836_v32 }
 0x5db   :  { %vm844_vm5 = vcmp.gt.f32.partialorder %v818_v33, %v838_v35 }
 0x5dc   :  { %v849_v37 = vsel %vm844_vm5, %v1045_v34, %v843_v36 }
 0x5dd   :  { %1192 = vmatmul.mubr.f32.vlgmr.msra.gmra.mrb[12].mxu0 %v849_v37  ;;  %850 = vst [vmem:[#allocation12] sm:$0x3] %v849_v37 }
 0x5de   :  { %1431 = shalt.err (!%p1428_p2)
}
 0x5df   :  { %s1432_s6 = scalar_lea.hbm %s1724_s10, 32 }
 0x5e0   :  { %p1433_p3 = scmp.ne.s32.totalorder %s1724_s10, %s1432_s6  ;;  %p1436_p4 = scmp.lt.u32.totalorder %s1432_s6, %s1724_s10 }
 0x5e2   :  { %p1438_p5 = pnand %p1436_p4, %p1433_p3 }
 0x5e4   :  { %1441 = shalt.err (!%p1438_p5)
}
 0x5e5   :  { %966 = dma.vmem_to_hbm [thread:$0]  %s964_s3, 32, %s1724_s10, [#allocation13]   ;;  %v1046_v38 = vld [vmem:[%s1721_s7] ss:$0 sm:$0xff] }
 0x5e6   :  { %s1490_s20 = smov [#allocation11]  }
 0x5e7   :  { %s953_s22 = sshll.u32 %s1490_s20, 4  ;;  %s954_s22 = int_to_ptr.vmem [resolvable:$true] %s953_s22 }
 0x5e8   :  { %s1442_s0 = scalar_lea.vmem %s954_s22, 32  ;;  %p1447_p7 = scmp.lt.s32.totalorder %s954_s22, %s954_s22 }
 0x5e9   :  { %p1443_p6 = scmp.ne.s32.totalorder %s954_s22, %s1442_s0  ;;  %p1448_p8 = scmp.lt.s32.totalorder %s1442_s0, %s1442_s0 }
 0x5eb   :  { %p1449_p9 = por %p1448_p8, %p1447_p7 }
 0x5ed   :  { %p1450_p10 = pnand %p1449_p9, %p1443_p6 }
 0x6b0   :  { %v934_v39 = vpop.f32.mrb[12].mxu0 }
 0x6b1   :  { %v944_v40 = vadd.f32 %v1046_v38, %v934_v39  ;;  %v1193_v41 = vpop.f32.mrb[13].mxu0 }
 0x6b3   :  { %v945_v42 = vmax.f32 %v944_v40, 0.0 }
 0x6b5   :  { %946 = vst [vmem:[#allocation11] sm:$0x3] %v945_v42 }
 0x6b6   :  { %1453 = shalt.err (!%p1450_p10)
}
 0x6b7   :  { %s1454_s5 = scalar_lea.hbm %s1723_s9, 32 }
 0x6b8   :  { %p1455_p11 = scmp.ne.s32.totalorder %s1723_s9, %s1454_s5  ;;  %p1458_p12 = scmp.lt.u32.totalorder %s1454_s5, %s1723_s9 }
 0x6ba   :  { %p1460_p13 = pnand %p1458_p12, %p1455_p11 }
 0x6bc   :  { %1463 = shalt.err (!%p1460_p13)
}
 0x6bd   :  { %956 = dma.vmem_to_hbm [thread:$0]  %s954_s22, 32, %s1723_s9, [#allocation4]  }
 0x6be   :  { %1470 = dma.done.wait [#allocation4], 32  }
 0x6bf   :  { %1471 = vsyncadd [#allocation4], 4294967264 }
 0x6c0   :  { %1472 = dma.done.wait [#allocation13], 32  }
 0x6c1   :  { %1473 = vsyncadd [#allocation13], 4294967264 }
 0x6c2   :  { %973 = vsyncpa [#allocation3], 1 }
 0x6c3   :  { %974 = vsyncpa [#allocation6], 1 }
 0x6c4   :  { %975 = vsyncpa [#allocation9], 1 }
 0x6c5   :  { %976 = vsyncpa [#allocation4], 1 }
 0x6c6   :  { %977 = vsyncpa [#allocation13], 1 }

</bundles_post_ra>
